<compile_context>
chip_gen: v7x
topology: tpu7x:2x2x1
jax: 0.10.0
libtpu: 0.0.40
codegen_flags: <defaults>
</compile_context>

<pallas_src>
import jax
import jax.numpy as jnp
from jax.experimental import pallas as pl
from jax.experimental.pallas import tpu as pltpu

_LANE = 128
_NEG = -1e30  # fill for padded logit lanes; exp(_NEG - max) underflows to 0


def _round_up(n, m):
    return ((n + m - 1) // m) * m


def _cdiv(a, b):
    return -(-a // b)


def _lenet300_kernel(x_ref, w1_ref, b1_ref, w2_ref, b2_ref, w3_ref, b3_ref,
                     out_ref):
    # x arrives as f32 (single HBM read); cast to bf16 on the VMEM tile.
    x = x_ref[...].astype(jnp.bfloat16)                               # (BM, 1024)

    # fc1 + ReLU (bf16 MXU, f32 accumulation, f32 elementwise)
    h1 = jnp.dot(x, w1_ref[...], preferred_element_type=jnp.float32)
    h1 = jnp.maximum(h1 + b1_ref[...], 0.0)                           # (BM, 384) f32

    # fc2 + ReLU
    h2 = jnp.dot(h1.astype(w2_ref.dtype), w2_ref[...],
                 preferred_element_type=jnp.float32)
    h2 = jnp.maximum(h2 + b2_ref[...], 0.0)                           # (BM, 128) f32

    # fc3 (logits); padded class lanes carry a -1e30 bias
    logits = jnp.dot(h2.astype(w3_ref.dtype), w3_ref[...],
                     preferred_element_type=jnp.float32)
    logits = logits + b3_ref[...]                                     # (BM, Cp) f32

    # log_softmax along dim=1 (numerically stable; padded lanes contribute 0)
    m = jnp.max(logits, axis=-1, keepdims=True)
    shifted = logits - m
    lse = jnp.log(jnp.sum(jnp.exp(shifted), axis=-1, keepdims=True))
    out_ref[...] = (shifted - lse).astype(out_ref.dtype)


def prepare_params(params):
    """Pad feature dims to 128-lane multiples and cast MXU operands to bf16.

    `params` are (in, out)-shaped f32 arrays (transposed vs torch.nn.Linear).
    Call once and reuse the result across forward calls.
    """
    w1, b1, w2, b2, w3, b3 = params
    d_in, h1 = w1.shape
    _, h2 = w2.shape
    _, c = w3.shape

    d_in_p = _round_up(d_in, _LANE)
    h1_p = _round_up(h1, _LANE)
    h2_p = _round_up(h2, _LANE)
    c_p = _round_up(c, _LANE)

    def pad2(a, rows, cols, fill=0.0):
        return jnp.pad(a, ((0, rows - a.shape[0]), (0, cols - a.shape[1])),
                       constant_values=fill)

    w1p = pad2(w1, d_in_p, h1_p).astype(jnp.bfloat16)
    w2p = pad2(w2, h1_p, h2_p).astype(jnp.bfloat16)
    w3p = pad2(w3, h2_p, c_p).astype(jnp.bfloat16)
    b1p = pad2(b1.reshape(1, -1), 1, h1_p).astype(jnp.float32)
    b2p = pad2(b2.reshape(1, -1), 1, h2_p).astype(jnp.float32)
    b3p = pad2(b3.reshape(1, -1), 1, c_p, fill=_NEG).astype(jnp.float32)
    return (w1p, b1p, w2p, b2p, w3p, b3p)


def _resident_spec(shape):
    """Same block every grid step -> DMA'd once, VMEM-resident, single-buffered."""
    index_map = lambda i: (0,) * len(shape)
    try:
        return pl.BlockSpec(shape, index_map, pipeline_mode=pl.Buffered(1))
    except (TypeError, ValueError):
        # Older JAX without pipeline_mode: fall back to default double-buffering.
        return pl.BlockSpec(shape, index_map)


def _pick_bm(B):
    """Batch tile: >=2 grid steps when B > 32 (megacore + DMA overlap),
    tiles up to 512 rows to amortize per-step overhead."""
    if B <= 32:
        return _round_up(max(B, 1), 16)
    return min(512, _round_up(_cdiv(B, 2), 16))


def lenet300_forward(x_nchw, prepared_params, num_classes):
    """x_nchw: (B, 1, 32, 32) f32. Returns log-probabilities (B, num_classes) f32."""
    w1, b1, w2, b2, w3, b3 = prepared_params
    d_in_p = w1.shape[0]
    c_p = w3.shape[1]

    B = x_nchw.shape[0]
    # x stays f32 end-to-end in the wrapper (reshape of contiguous data is free);
    # the bf16 cast happens inside the kernel on the VMEM tile.
    x0 = x_nchw.reshape(B, -1)                         # == x.view(-1, 32*32)
    if x0.shape[1] != d_in_p:                          # 1024 is already lane-aligned
        x0 = jnp.pad(x0, ((0, 0), (0, d_in_p - x0.shape[1])))

    bm = _pick_bm(B)
    nb = _cdiv(B, bm)
    b_pad = nb * bm
    if b_pad != B:
        x0 = jnp.pad(x0, ((0, b_pad - B), (0, 0)))

    out = pl.pallas_call(
        _lenet300_kernel,
        out_shape=jax.ShapeDtypeStruct((b_pad, c_p), jnp.float32),
        grid=(nb,),
        in_specs=[
            pl.BlockSpec((bm, d_in_p), lambda i: (i, 0)),
            _resident_spec(w1.shape), _resident_spec(b1.shape),
            _resident_spec(w2.shape), _resident_spec(b2.shape),
            _resident_spec(w3.shape), _resident_spec(b3.shape),
        ],
        out_specs=pl.BlockSpec((bm, c_p), lambda i: (i, 0)),
        compiler_params=pltpu.CompilerParams(
            dimension_semantics=("parallel",),
            vmem_limit_bytes=16 << 20),
    )(x0, w1, b1, w2, b2, w3, b3)

    return out[:B, :num_classes]


def init_params(key, num_classes=10):
    """Deterministic params mirroring nn.Linear shapes (stored as (in, out)), f32."""
    ks = jax.random.split(key, 6)

    def linear(kw, kb, fan_in, fan_out):
        bound = 1.0 / jnp.sqrt(fan_in)
        w = jax.random.uniform(kw, (fan_in, fan_out), jnp.float32, -bound, bound)
        b = jax.random.uniform(kb, (1, fan_out), jnp.float32, -bound, bound)
        return w, b

    w1, b1 = linear(ks[0], ks[1], 32 * 32, 300)
    w2, b2 = linear(ks[2], ks[3], 300, 100)
    w3, b3 = linear(ks[4], ks[5], 100, num_classes)
    return (w1, b1, w2, b2, w3, b3)


def _reference(x, raw_params):
    """Pure-JAX reference mirroring the kernel's bf16 MXU operands (f32 accum)."""
    w1, b1, w2, b2, w3, b3 = raw_params
    bf = lambda a: a.astype(jnp.bfloat16).astype(jnp.float32)
    x0 = bf(x.reshape(x.shape[0], 32 * 32))
    h1 = jnp.maximum(x0 @ bf(w1) + b1, 0.0)
    h2 = jnp.maximum(bf(h1) @ bf(w2) + b2, 0.0)
    logits = bf(h2) @ bf(w3) + b3
    return jax.nn.log_softmax(logits, axis=1)


# TODO(synk): optimizer / scheduler / CrossEntropyLoss from the module are
# training-only and have no place in this forward-pass kernel.

if __name__ == "__main__":
    key = jax.random.PRNGKey(0)
    k_x, k_x2, k_p = jax.random.split(key, 3)

    num_classes = 10
    raw_params = init_params(k_p, num_classes=num_classes)
    prepared = prepare_params(raw_params)   # pad + bf16 cast, done once

    # MNIST-like input implied by fc1 = Linear(32*32, ...): NCHW (B, 1, 32, 32)
    # Small batch (single grid step).
    x = jax.random.normal(k_x, (8, 1, 32, 32), jnp.float32)
    out = jax.block_until_ready(lenet300_forward(x, prepared, num_classes))
    ref = _reference(x, raw_params)
    assert out.shape == (8, num_classes)
    assert jnp.allclose(out, ref, atol=2e-2, rtol=2e-2), "mismatch vs reference (B=8)"

    # Slightly larger batch exercising the multi-step (2-tile) grid path.
    x2 = jax.random.normal(k_x2, (40, 1, 32, 32), jnp.float32)
    out2 = jax.block_until_ready(lenet300_forward(x2, prepared, num_classes))
    ref2 = _reference(x2, raw_params)
    assert out2.shape == (40, num_classes)
    assert jnp.allclose(out2, ref2, atol=2e-2, rtol=2e-2), "mismatch vs reference (B=40)"

    print("KERNEL_OK")
</pallas_src>

<mosaic_0001>
module attributes {stable_mosaic.version = 11 : i64} {
  func.func @_lenet300_kernel(%arg0: i32, %arg1: memref<16x1024xf32, #tpu.memory_space<vmem>>, %arg2: memref<1024x384xbf16, #tpu.memory_space<vmem>>, %arg3: memref<1x384xf32, #tpu.memory_space<vmem>>, %arg4: memref<384x128xbf16, #tpu.memory_space<vmem>>, %arg5: memref<1x128xf32, #tpu.memory_space<vmem>>, %arg6: memref<128x128xbf16, #tpu.memory_space<vmem>>, %arg7: memref<1x128xf32, #tpu.memory_space<vmem>>, %arg8: memref<16x128xf32, #tpu.memory_space<vmem>>) attributes {dimension_semantics = [#tpu.dimension_semantics<parallel>], iteration_bounds = array<i64: 1>, scalar_prefetch = 0 : i64, scratch_operands = 0 : i64, tpu.core_type = #tpu.core_type<tc>, window_params = [{transform_indices = @transform_0, window_bounds = array<i64: 16, 1024>}, {pipeline_mode = #tpu.pipeline_mode<synchronous>, transform_indices = @transform_1, window_bounds = array<i64: 1024, 384>}, {pipeline_mode = #tpu.pipeline_mode<synchronous>, transform_indices = @transform_2, window_bounds = array<i64: 1, 384>}, {pipeline_mode = #tpu.pipeline_mode<synchronous>, transform_indices = @transform_3, window_bounds = array<i64: 384, 128>}, {pipeline_mode = #tpu.pipeline_mode<synchronous>, transform_indices = @transform_4, window_bounds = array<i64: 1, 128>}, {pipeline_mode = #tpu.pipeline_mode<synchronous>, transform_indices = @transform_5, window_bounds = array<i64: 128, 128>}, {pipeline_mode = #tpu.pipeline_mode<synchronous>, transform_indices = @transform_6, window_bounds = array<i64: 1, 128>}, {transform_indices = @transform_7, window_bounds = array<i64: 16, 128>}]} {
    %c0 = arith.constant 0 : index
    %c0_0 = arith.constant 0 : index
    %0 = vector.load %arg1[%c0, %c0_0] : memref<16x1024xf32, #tpu.memory_space<vmem>>, vector<16x1024xf32>
    %1 = arith.truncf %0 : vector<16x1024xf32> to vector<16x1024xbf16>
    %c0_1 = arith.constant 0 : index
    %c0_2 = arith.constant 0 : index
    %2 = vector.load %arg2[%c0_1, %c0_2] : memref<1024x384xbf16, #tpu.memory_space<vmem>>, vector<1024x384xbf16>
    %cst = arith.constant dense<0.000000e+00> : vector<16x384xf32>
    %3 = tpu.matmul %1, %2, %cst {dimension_numbers = #tpu.dot_dimension_numbers<[1], [0], [0], [1], [0, 0, 1, 1], [], []>} : vector<16x1024xbf16>, vector<1024x384xbf16>, vector<16x384xf32> -> vector<16x384xf32>
    %c0_3 = arith.constant 0 : index
    %c0_4 = arith.constant 0 : index
    %4 = vector.load %arg3[%c0_3, %c0_4] : memref<1x384xf32, #tpu.memory_space<vmem>>, vector<1x384xf32>
    %5 = vector.broadcast %4 : vector<1x384xf32> to vector<16x384xf32>
    %6 = arith.addf %3, %5 : vector<16x384xf32>
    %cst_5 = arith.constant 0.000000e+00 : f32
    %7 = vector.broadcast %cst_5 : f32 to vector<16x384xf32>
    %8 = arith.maximumf %6, %7 : vector<16x384xf32>
    %9 = arith.truncf %8 : vector<16x384xf32> to vector<16x384xbf16>
    %c0_6 = arith.constant 0 : index
    %c0_7 = arith.constant 0 : index
    %10 = vector.load %arg4[%c0_6, %c0_7] : memref<384x128xbf16, #tpu.memory_space<vmem>>, vector<384x128xbf16>
    %cst_8 = arith.constant dense<0.000000e+00> : vector<16x128xf32>
    %11 = tpu.matmul %9, %10, %cst_8 {dimension_numbers = #tpu.dot_dimension_numbers<[1], [0], [0], [1], [0, 0, 1, 1], [], []>} : vector<16x384xbf16>, vector<384x128xbf16>, vector<16x128xf32> -> vector<16x128xf32>
    %c0_9 = arith.constant 0 : index
    %c0_10 = arith.constant 0 : index
    %12 = vector.load %arg5[%c0_9, %c0_10] : memref<1x128xf32, #tpu.memory_space<vmem>>, vector<1x128xf32>
    %13 = vector.broadcast %12 : vector<1x128xf32> to vector<16x128xf32>
    %14 = arith.addf %11, %13 : vector<16x128xf32>
    %cst_11 = arith.constant 0.000000e+00 : f32
    %15 = vector.broadcast %cst_11 : f32 to vector<16x128xf32>
    %16 = arith.maximumf %14, %15 : vector<16x128xf32>
    %17 = arith.truncf %16 : vector<16x128xf32> to vector<16x128xbf16>
    %c0_12 = arith.constant 0 : index
    %c0_13 = arith.constant 0 : index
    %18 = vector.load %arg6[%c0_12, %c0_13] : memref<128x128xbf16, #tpu.memory_space<vmem>>, vector<128x128xbf16>
    %cst_14 = arith.constant dense<0.000000e+00> : vector<16x128xf32>
    %19 = tpu.matmul %17, %18, %cst_14 {dimension_numbers = #tpu.dot_dimension_numbers<[1], [0], [0], [1], [0, 0, 1, 1], [], []>} : vector<16x128xbf16>, vector<128x128xbf16>, vector<16x128xf32> -> vector<16x128xf32>
    %c0_15 = arith.constant 0 : index
    %c0_16 = arith.constant 0 : index
    %20 = vector.load %arg7[%c0_15, %c0_16] : memref<1x128xf32, #tpu.memory_space<vmem>>, vector<1x128xf32>
    %21 = vector.broadcast %20 : vector<1x128xf32> to vector<16x128xf32>
    %22 = arith.addf %19, %21 : vector<16x128xf32>
    %cst_17 = arith.constant dense<0xFF800000> : vector<16xf32>
    %23 = vector.multi_reduction <maximumf>, %22, %cst_17 [1] : vector<16x128xf32> to vector<16xf32>
    %24 = vector.shape_cast %23 : vector<16xf32> to vector<16x1xf32>
    %25 = vector.broadcast %24 : vector<16x1xf32> to vector<16x128xf32>
    %26 = arith.subf %22, %25 : vector<16x128xf32>
    %27 = math.exp %26 : vector<16x128xf32>
    %cst_18 = arith.constant dense<0.000000e+00> : vector<16xf32>
    %28 = vector.multi_reduction <add>, %27, %cst_18 [1] : vector<16x128xf32> to vector<16xf32>
    %29 = vector.shape_cast %28 : vector<16xf32> to vector<16x1xf32>
    %30 = math.log %29 : vector<16x1xf32>
    %31 = vector.broadcast %30 : vector<16x1xf32> to vector<16x128xf32>
    %32 = arith.subf %26, %31 : vector<16x128xf32>
    %c0_19 = arith.constant 0 : index
    %c0_20 = arith.constant 0 : index
    %33 = vector.load %arg8[%c0_19, %c0_20] : memref<16x128xf32, #tpu.memory_space<vmem>>, vector<16x128xf32>
    tpu.vector_store %arg8[%c0_19, %c0_20], %32 {strides = array<i32>} : memref<16x128xf32, #tpu.memory_space<vmem>>, vector<16x128xf32>,
    return
  }
  func.func @transform_0(%arg0: i32) -> (i32, i32) {
    %c0_i32 = arith.constant 0 : i32
    %c0_i32_0 = arith.constant 0 : i32
    return %arg0, %c0_i32 : i32, i32
  }
  func.func @transform_1(%arg0: i32) -> (i32, i32) {
    %c0_i32 = arith.constant 0 : i32
    %c0_i32_0 = arith.constant 0 : i32
    %c0_i32_1 = arith.constant 0 : i32
    return %c0_i32, %c0_i32_0 : i32, i32
  }
  func.func @transform_2(%arg0: i32) -> (i32, i32) {
    %c0_i32 = arith.constant 0 : i32
    %c0_i32_0 = arith.constant 0 : i32
    %c0_i32_1 = arith.constant 0 : i32
    return %c0_i32, %c0_i32_0 : i32, i32
  }
  func.func @transform_3(%arg0: i32) -> (i32, i32) {
    %c0_i32 = arith.constant 0 : i32
    %c0_i32_0 = arith.constant 0 : i32
    %c0_i32_1 = arith.constant 0 : i32
    return %c0_i32, %c0_i32_0 : i32, i32
  }
  func.func @transform_4(%arg0: i32) -> (i32, i32) {
    %c0_i32 = arith.constant 0 : i32
    %c0_i32_0 = arith.constant 0 : i32
    %c0_i32_1 = arith.constant 0 : i32
    return %c0_i32, %c0_i32_0 : i32, i32
  }
  func.func @transform_5(%arg0: i32) -> (i32, i32) {
    %c0_i32 = arith.constant 0 : i32
    %c0_i32_0 = arith.constant 0 : i32
    %c0_i32_1 = arith.constant 0 : i32
    return %c0_i32, %c0_i32_0 : i32, i32
  }
  func.func @transform_6(%arg0: i32) -> (i32, i32) {
    %c0_i32 = arith.constant 0 : i32
    %c0_i32_0 = arith.constant 0 : i32
    %c0_i32_1 = arith.constant 0 : i32
    return %c0_i32, %c0_i32_0 : i32, i32
  }
  func.func @transform_7(%arg0: i32) -> (i32, i32) {
    %c0_i32 = arith.constant 0 : i32
    %c0_i32_0 = arith.constant 0 : i32
    return %arg0, %c0_i32 : i32, i32
  }
}

</mosaic_0001>

<bundles_post_ra>
// kernel: tpu_custom_call.1
= control target key start
LH: loop header
LB: loop body
LE: loop exit
PB: predicated region body
PF: predicated region fallthrough
CT: control target
= control target key end

     0   :  { %12 = vsyncpa [#allocation3], 0  ;;  %s3188_s0 = inlined_call_operand.hbm [shape: f32[16,1024], index: 0, kind: input, shape index: {}]   ;;  %s3189_s1 = inlined_call_operand.hbm [shape: bf16[1024,384], index: 1, kind: input, shape index: {}]   ;;  %s3190_s2 = inlined_call_operand.vmem [shape: f32[1,384], index: 2, kind: input, shape index: {}]   ;;  %s3191_s3 = inlined_call_operand.hbm [shape: bf16[384,128], index: 3, kind: input, shape index: {}]   ;;  %s3192_s4 = inlined_call_operand.vmem [shape: f32[1,128], index: 4, kind: input, shape index: {}]   ;;  %s3193_s5 = inlined_call_operand.hbm [shape: bf16[128,128], index: 5, kind: input, shape index: {}]   ;;  %s3194_s6 = inlined_call_operand.vmem [shape: f32[1,128], index: 6, kind: input, shape index: {}]   ;;  %s3195_s7 = inlined_call_operand.hbm [shape: f32[16,128], index: 7, kind: output, shape index: {}]  }
   0x1   :  { %13 = vsyncpa [#allocation6], 0 }
   0x2   :  { %14 = vsyncpa [#allocation9], 0 }
   0x3   :  { %15 = vsyncpa [#allocation4], 0  ;;  %s3024_s24 = smov [#allocation5]   ;;  %s2906_s28 = scalar_lea.hbm %s3189_s1, 24576 }
   0x4   :  { %s33_s25 = sshll.u32 %s3024_s24, 4  ;;  %p2907_p0 = scmp.ne.s32.totalorder %s3189_s1, %s2906_s28  ;;  %s34_s25 = int_to_ptr.vmem [resolvable:$true] %s33_s25 }
   0x5   :  { %p2910_p1 = scmp.lt.u32.totalorder %s2906_s28, %s3189_s1 }
   0x7   :  { %p2912_p2 = pnand %p2910_p1, %p2907_p0 }
   0x9   :  { %2915 = shalt.err (!%p2912_p2)
}
   0xa   :  { %s2916_s10 = scalar_lea.vmem %s34_s25, 24576  ;;  %p2921_p4 = scmp.lt.s32.totalorder %s34_s25, %s34_s25 }
   0xb   :  { %p2917_p3 = scmp.ne.s32.totalorder %s34_s25, %s2916_s10  ;;  %p2922_p5 = scmp.lt.s32.totalorder %s2916_s10, %s2916_s10 }
   0xd   :  { %p2923_p6 = por %p2922_p5, %p2921_p4 }
   0xf   :  { %p2924_p7 = pnand %p2923_p6, %p2917_p3 }
  0x11   :  { %2927 = shalt.err (!%p2924_p7)
}
  0x12   :  { %s3025_s11 = smov 192   ;;  %s3026_s12 = smov 12  }
  0x13   :  { %39 = dma.hbm_to_vmem [thread:$0]  %s3189_s1, 24576, %s34_s25, [#allocation6], %s3025_s11, %s3025_s11, %s3026_s12  }
  0x14   :  { %s3027_s15 = smov [#allocation2]   ;;  %s2928_s19 = scalar_lea.hbm %s3188_s0, 2048 }
  0x15   :  { %s21_s16 = sshll.u32 %s3027_s15, 4  ;;  %p2929_p8 = scmp.ne.s32.totalorder %s3188_s0, %s2928_s19  ;;  %s22_s16 = int_to_ptr.vmem [resolvable:$true] %s21_s16 }
  0x16   :  { %p2932_p9 = scmp.lt.u32.totalorder %s2928_s19, %s3188_s0 }
  0x18   :  { %p2934_p10 = pnand %p2932_p9, %p2929_p8 }
  0x1a   :  { %2937 = shalt.err (!%p2934_p10)
}
  0x1b   :  { %s2938_s24 = scalar_lea.vmem %s22_s16, 2048  ;;  %p2943_p12 = scmp.lt.s32.totalorder %s22_s16, %s22_s16 }
  0x1c   :  { %p2939_p11 = scmp.ne.s32.totalorder %s22_s16, %s2938_s24  ;;  %p2944_p13 = scmp.lt.s32.totalorder %s2938_s24, %s2938_s24 }
  0x1e   :  { %p2945_p0 = por %p2944_p13, %p2943_p12 }
  0x20   :  { %p2946_p1 = pnand %p2945_p0, %p2939_p11 }
  0x22   :  { %2949 = shalt.err (!%p2946_p1)
}
  0x23   :  { %s3028_s1 = smov 1024   ;;  %s3029_s25 = smov 64  }
  0x24   :  { %27 = dma.hbm_to_vmem [thread:$0]  %s3188_s0, 2048, %s22_s16, [#allocation3], %s3028_s1, %s3028_s1, %s3029_s25  }
  0x25   :  { %s3030_s28 = smov [#allocation7]   ;;  %s3031_s30 = smov [#allocation8]  }
  0x26   :  { %s47_s29 = sshll.u32 %s3030_s28, 4  ;;  %s61_s8 = sshll.u32 %s3031_s30, 4  ;;  %s48_s29 = int_to_ptr.vmem [resolvable:$true] %s47_s29  ;;  %s62_s8 = int_to_ptr.vmem [resolvable:$true] %s61_s8 }
  0x27   :  { %s2950_s11 = scalar_lea.hbm %s3191_s3, 3072 }
  0x28   :  { %p2951_p2 = scmp.ne.s32.totalorder %s3191_s3, %s2950_s11  ;;  %p2954_p3 = scmp.lt.u32.totalorder %s2950_s11, %s3191_s3 }
  0x2a   :  { %p2956_p4 = pnand %p2954_p3, %p2951_p2 }
  0x2c   :  { %2959 = shalt.err (!%p2956_p4)
}
  0x2d   :  { %s2960_s0 = scalar_lea.vmem %s48_s29, 3072  ;;  %p2965_p6 = scmp.lt.s32.totalorder %s48_s29, %s48_s29 }
  0x2e   :  { %p2961_p5 = scmp.ne.s32.totalorder %s48_s29, %s2960_s0  ;;  %p2966_p7 = scmp.lt.s32.totalorder %s2960_s0, %s2960_s0 }
  0x30   :  { %p2967_p8 = por %p2966_p7, %p2965_p6 }
  0x32   :  { %p2968_p9 = pnand %p2967_p8, %p2961_p5 }
  0x34   :  { %2971 = shalt.err (!%p2968_p9)
}
  0x35   :  { %s3032_s16 = smov 4   ;;  %s2972_s21 = scalar_lea.hbm %s3193_s5, 1024 }
  0x36   :  { %53 = dma.hbm_to_vmem [thread:$0]  %s3191_s3, 3072, %s48_s29, [#allocation6], %s3029_s25, %s3029_s25, %s3032_s16  }
  0x37   :  { %p2973_p10 = scmp.ne.s32.totalorder %s3193_s5, %s2972_s21  ;;  %p2976_p11 = scmp.lt.u32.totalorder %s2972_s21, %s3193_s5 }
  0x39   :  { %p2978_p12 = pnand %p2976_p11, %p2973_p10 }
  0x3b   :  { %2981 = shalt.err (!%p2978_p12)
}
  0x3c   :  { %s2982_s26 = scalar_lea.vmem %s62_s8, 1024  ;;  %p2987_p0 = scmp.lt.s32.totalorder %s62_s8, %s62_s8 }
  0x3d   :  { %p2983_p13 = scmp.ne.s32.totalorder %s62_s8, %s2982_s26  ;;  %p2988_p1 = scmp.lt.s32.totalorder %s2982_s26, %s2982_s26 }
  0x3f   :  { %p2989_p2 = por %p2988_p1, %p2987_p0 }
  0x41   :  { %p2990_p3 = pnand %p2989_p2, %p2983_p13 }
  0x43   :  { %2993 = shalt.err (!%p2990_p3)
}
  0x44   :  { %67 = dma.hbm_to_vmem [thread:$0]  %s3193_s5, 1024, %s62_s8, [#allocation9], %s3029_s25, %s3029_s25, %s3032_s16  }
  0x45   :  { %3016 = dma.done.wait [#allocation3], 2048  }
  0x46   :  { %3017 = vsyncadd [#allocation3], 4294965248 }
  0x47   :  { %3018 = dma.done.wait [#allocation6], 27648  }
  0x48   :  { %3019 = vsyncadd [#allocation6], 4294939648 }
  0x49   :  { %3020 = dma.done.wait [#allocation9], 1024  }
  0x4a   :  { %3021 = vsyncadd [#allocation9], 4294966272  ;;  %v2610_v0 = vld [vmem:[#allocation5 + $0x4] ss:$12 sps:$4 sm:$0xff]   ;;  %v2612_v1 = vld [vmem:[#allocation5] ss:$12 sps:$4 sm:$0xff]  }
  0x4b   :  { %1404 = vmatprep.subr.bf16.mxu0 %v2610_v0  ;;  %v2613_v2 = vld [vmem:[#allocation5 + $0x1c] ss:$12 sps:$4 sm:$0xff]   ;;  %v2615_v3 = vld [vmem:[#allocation5 + $0x18] ss:$12 sps:$4 sm:$0xff]   ;;  %v2616_v4 = vld [vmem:[#allocation5 + $0x34] ss:$12 sps:$4 sm:$0xff]  }
  0x4c   :  { %1405 = vmatpush1.bf16.msra.mxu0 %v2612_v1  ;;  %v2618_v5 = vld [vmem:[#allocation5 + $0x30] ss:$12 sps:$4 sm:$0xff]   ;;  %v2619_v6 = vld [vmem:[#allocation5 + $0x4c] ss:$12 sps:$4 sm:$0xff]   ;;  %v2621_v7 = vld [vmem:[#allocation5 + $0x48] ss:$12 sps:$4 sm:$0xff]  }
  0x4d   :  { %1406 = vmatprep.subr.bf16.mxu0 %v2613_v2  ;;  %v2622_v8 = vld [vmem:[#allocation5 + $0x64] ss:$12 sps:$4 sm:$0xff]   ;;  %v2624_v9 = vld [vmem:[#allocation5 + $0x60] ss:$12 sps:$4 sm:$0xff]   ;;  %v2625_v10 = vld [vmem:[#allocation5 + $0x7c] ss:$12 sps:$4 sm:$0xff]  }
  0x4e   :  { %v2627_v11 = vld [vmem:[#allocation5 + $0x78] ss:$12 sps:$4 sm:$0xff]   ;;  %v2628_v12 = vld [vmem:[#allocation5 + $0x94] ss:$12 sps:$4 sm:$0xff]   ;;  %v84_v13 = vld [vmem:[#allocation2 + $0x8] sm:$0xff]  ;;  %vm3034_vm0 = vmmov 0  }
  0x4f   :  { %v92_v14 = vld [vmem:[#allocation2 + $0x48] sm:$0xff]  ;;  %v2630_v16 = vld [vmem:[#allocation5 + $0x90] ss:$12 sps:$4 sm:$0xff]   ;;  %v2671_v26 = vld [vmem:[#allocation5 + $0xf8] ss:$12 sps:$4 sm:$0xff]  }
  0x50   :  { %1407 = vmatpush1.bf16.msra.mxu0 %v2615_v3  ;;  %v100_v15 = vpack.c.bf16 %v92_v14, %v84_v13  ;;  %v2631_v17 = vld [vmem:[#allocation5 + $0xac] ss:$12 sps:$4 sm:$0xff]   ;;  %v2661_v18 = vld [vmem:[#allocation5 + $0xc8] ss:$12 sps:$4 sm:$0xff]   ;;  %v2634_v21 = vld [vmem:[#allocation5 + $0xc4] ss:$12 sps:$4 sm:$0xff]  }
  0x51   :  { %1408 = vmatprep.subr.bf16.mxu0 %v2616_v4  ;;  %v2662_v19 = vld [vmem:[#allocation5 + $0x8] ss:$12 sps:$4 sm:$0xff]   ;;  %2412 = vmatprep.subr.bf16.mxu1 %v2661_v18  ;;  %v2666_v22 = vld [vmem:[#allocation5 + $0xe0] ss:$12 sps:$4 sm:$0xff]   ;;  %v2672_v27 = vld [vmem:[#allocation5 + $0x38] ss:$12 sps:$4 sm:$0xff]  }
  0x52   :  { %1436 = vmatprep.mubr.bf16.mxu0 %v100_v15  ;;  %1608 = vmatprep.mubr.bf16.mxu1 %v100_v15  ;;  %v2633_v20 = vld [vmem:[#allocation5 + $0xa8] ss:$12 sps:$4 sm:$0xff]   ;;  %v2667_v23 = vld [vmem:[#allocation5 + $0x20] ss:$12 sps:$4 sm:$0xff]   ;;  %v2639_v28 = vld [vmem:[#allocation5 + $0xd8] ss:$12 sps:$4 sm:$0xff]  }
  0x53   :  { %2413 = vmatpush3.bf16.msra.mxu1 %v2662_v19  ;;  %v2636_v24 = vld [vmem:[#allocation5 + $0xc0] ss:$12 sps:$4 sm:$0xff]   ;;  %v2637_v25 = vld [vmem:[#allocation5 + $0xdc] ss:$12 sps:$4 sm:$0xff]   ;;  %v2646_v38 = vld [vmem:[#allocation5 + $0x124] ss:$12 sps:$4 sm:$0xff]  }
  0x54   :  { %1409 = vmatpush1.bf16.msra.mxu0 %v2618_v5  ;;  %2414 = vmatprep.subr.bf16.mxu1 %v2666_v22  ;;  %v2676_v29 = vld [vmem:[#allocation5 + $0x110] ss:$12 sps:$4 sm:$0xff]   ;;  %v2640_v31 = vld [vmem:[#allocation5 + $0xf4] ss:$12 sps:$4 sm:$0xff]   ;;  %v2643_v35 = vld [vmem:[#allocation5 + $0x10c] ss:$12 sps:$4 sm:$0xff]  }
  0x55   :  { %1410 = vmatprep.subr.bf16.mxu0 %v2619_v6  ;;  %v2677_v30 = vld [vmem:[#allocation5 + $0x50] ss:$12 sps:$4 sm:$0xff]   ;;  %v2681_v33 = vld [vmem:[#allocation5 + $0x128] ss:$12 sps:$4 sm:$0xff]   ;;  %v2686_v36 = vld [vmem:[#allocation5 + $0x140] ss:$12 sps:$4 sm:$0xff]  }
  0x56   :  { %v2642_v32 = vld [vmem:[#allocation5 + $0xf0] ss:$12 sps:$4 sm:$0xff]   ;;  %v2682_v34 = vld [vmem:[#allocation5 + $0x68] ss:$12 sps:$4 sm:$0xff]   ;;  %v2687_v39 = vld [vmem:[#allocation5 + $0x80] ss:$12 sps:$4 sm:$0xff]  }
  0x57   :  { %2415 = vmatpush3.bf16.msra.mxu1 %v2667_v23  ;;  %v2645_v37 = vld [vmem:[#allocation5 + $0x108] ss:$12 sps:$4 sm:$0xff]   ;;  %v2691_v40 = vld [vmem:[#allocation5 + $0x158] ss:$12 sps:$4 sm:$0xff]   ;;  %v2648_v41 = vld [vmem:[#allocation5 + $0x120] ss:$12 sps:$4 sm:$0xff]  }
  0x58   :  { %1411 = vmatpush1.bf16.msra.mxu0 %v2621_v7  ;;  %2416 = vmatprep.subr.bf16.mxu1 %v2671_v26  ;;  %v2649_v42 = vld [vmem:[#allocation5 + $0x13c] ss:$12 sps:$4 sm:$0xff]   ;;  %v2692_v43 = vld [vmem:[#allocation5 + $0x98] ss:$12 sps:$4 sm:$0xff]   ;;  %v2652_v46 = vld [vmem:[#allocation5 + $0x154] ss:$12 sps:$4 sm:$0xff]  }
  0x59   :  { %1412 = vmatprep.subr.bf16.mxu0 %v2622_v8  ;;  %v2696_v44 = vld [vmem:[#allocation5 + $0x170] ss:$12 sps:$4 sm:$0xff]   ;;  %v2651_v45 = vld [vmem:[#allocation5 + $0x138] ss:$12 sps:$4 sm:$0xff]   ;;  %v2701_v48 = vld [vmem:[#allocation5 + $0x248] ss:$12 sps:$4 sm:$0xff]  }
  0x5a   :  { %v2697_v47 = vld [vmem:[#allocation5 + $0xb0] ss:$12 sps:$4 sm:$0xff]   ;;  %v83_v50 = vld [vmem:[#allocation2] sm:$0xff]  ;;  %v2655_v52 = vld [vmem:[#allocation5 + $0x16c] ss:$12 sps:$4 sm:$0xff]  }
  0x5b   :  { %2417 = vmatpush3.bf16.msra.mxu1 %v2672_v27  ;;  %v2654_v49 = vld [vmem:[#allocation5 + $0x150] ss:$12 sps:$4 sm:$0xff]   ;;  %v91_v51 = vld [vmem:[#allocation2 + $0x40] sm:$0xff]  ;;  %v2702_v53 = vld [vmem:[#allocation5 + $0x188] ss:$12 sps:$4 sm:$0xff]  }
  0x5c   :  { %1413 = vmatpush1.bf16.msra.mxu0 %v2624_v9  ;;  %2418 = vmatprep.subr.bf16.mxu1 %v2676_v29  ;;  %v99_v54 = vpack.c.bf16 %v91_v51, %v83_v50  ;;  %v2706_v55 = vld [vmem:[#allocation5 + $0x260] ss:$12 sps:$4 sm:$0xff]   ;;  %v2657_v56 = vld [vmem:[#allocation5 + $0x168] ss:$12 sps:$4 sm:$0xff]   ;;  %v2660_v58 = vld [vmem:[#allocation5 + $0x184] ss:$12 sps:$4 sm:$0xff]  }
  0x5d   :  { %1414 = vmatprep.subr.bf16.mxu0 %v2625_v10  ;;  %v2707_v57 = vld [vmem:[#allocation5 + $0x1a0] ss:$12 sps:$4 sm:$0xff]   ;;  %v2711_v59 = vld [vmem:[#allocation5 + $0x278] ss:$12 sps:$4 sm:$0xff]   ;;  %v2665_v61 = vld [vmem:[#allocation5 + $0x19c] ss:$12 sps:$4 sm:$0xff]  }
  0x5e   :  { %v2658_v60 = vld [vmem:[#allocation5 + $0x180] ss:$12 sps:$4 sm:$0xff]   ;;  %v2712_v62 = vld [vmem:[#allocation5 + $0x1b8] ss:$12 sps:$4 sm:$0xff]   ;;  %v2716_v63 = vld [vmem:[#allocation5 + $0x290] ss:$12 sps:$4 sm:$0xff]  }
  0x5f   :  { %2419 = vmatpush3.bf16.msra.mxu1 %v2677_v30  ;;  %v2663_v0 = vld [vmem:[#allocation5 + $0x198] ss:$12 sps:$4 sm:$0xff]   ;;  %v2670_v1 = vld [vmem:[#allocation5 + $0x1b4] ss:$12 sps:$4 sm:$0xff]   ;;  %v2717_v2 = vld [vmem:[#allocation5 + $0x1d0] ss:$12 sps:$4 sm:$0xff]  }
  0x60   :  { %1415 = vmatpush1.bf16.msra.mxu0 %v2627_v11  ;;  %2420 = vmatprep.subr.bf16.mxu1 %v2681_v33  ;;  %v2721_v3 = vld [vmem:[#allocation5 + $0x2a8] ss:$12 sps:$4 sm:$0xff]   ;;  %v2668_v4 = vld [vmem:[#allocation5 + $0x1b0] ss:$12 sps:$4 sm:$0xff]   ;;  %v2675_v5 = vld [vmem:[#allocation5 + $0x1cc] ss:$12 sps:$4 sm:$0xff]  }
  0x61   :  { %1416 = vmatprep.subr.bf16.mxu0 %v2628_v12  ;;  %v2722_v6 = vld [vmem:[#allocation5 + $0x1e8] ss:$12 sps:$4 sm:$0xff]   ;;  %v2726_v7 = vld [vmem:[#allocation5 + $0x2c0] ss:$12 sps:$4 sm:$0xff]   ;;  %v2680_v9 = vld [vmem:[#allocation5 + $0x1e4] ss:$12 sps:$4 sm:$0xff]  }
  0x62   :  { %v2673_v8 = vld [vmem:[#allocation5 + $0x1c8] ss:$12 sps:$4 sm:$0xff]   ;;  %v2727_v10 = vld [vmem:[#allocation5 + $0x200] ss:$12 sps:$4 sm:$0xff]   ;;  %v2731_v11 = vld [vmem:[#allocation5 + $0x2d8] ss:$12 sps:$4 sm:$0xff]  }
  0x63   :  { %2421 = vmatpush3.bf16.msra.mxu1 %v2682_v34  ;;  %v86_v12 = vld [vmem:[#allocation2 + $0x18] sm:$0xff]  ;;  %v2678_v15 = vld [vmem:[#allocation5 + $0x1e0] ss:$12 sps:$4 sm:$0xff]   ;;  %v85_v22 = vld [vmem:[#allocation2 + $0x10] sm:$0xff] }
  0x64   :  { %1417 = vmatpush1.bf16.msra.mxu0 %v2630_v16  ;;  %2422 = vmatprep.subr.bf16.mxu1 %v2686_v36  ;;  %v94_v13 = vld [vmem:[#allocation2 + $0x58] sm:$0xff]  ;;  %v2741_v23 = vld [vmem:[#allocation5 + $0x3c8] ss:$12 sps:$4 sm:$0xff]   ;;  %v2746_v29 = vld [vmem:[#allocation5 + $0x3e0] ss:$12 sps:$4 sm:$0xff]  }
  0x65   :  { %1418 = vmatprep.subr.bf16.mxu0 %v2631_v17  ;;  %v102_v14 = vpack.c.bf16 %v94_v13, %v86_v12  ;;  %v2685_v16 = vld [vmem:[#allocation5 + $0x1fc] ss:$12 sps:$4 sm:$0xff]   ;;  %v2732_v17 = vld [vmem:[#allocation5 + $0x218] ss:$12 sps:$4 sm:$0xff]   ;;  %v2698_v34 = vld [vmem:[#allocation5 + $0x240] ss:$12 sps:$4 sm:$0xff]  }
  0x66   :  { %v2736_v18 = vld [vmem:[#allocation5 + $0x2f0] ss:$12 sps:$4 sm:$0xff]   ;;  %v2683_v19 = vld [vmem:[#allocation5 + $0x1f8] ss:$12 sps:$4 sm:$0xff]   ;;  %v2742_v26 = vld [vmem:[#allocation5 + $0x308] ss:$12 sps:$4 sm:$0xff]  }
  0x67   :  { %2423 = vmatpush3.bf16.msra.mxu1 %v2687_v39  ;;  %v2695_v27 = vld [vmem:[#allocation5 + $0x22c] ss:$12 sps:$4 sm:$0xff]   ;;  %v2693_v30 = vld [vmem:[#allocation5 + $0x228] ss:$12 sps:$4 sm:$0xff]   ;;  %v2720_v50 = vld [vmem:[#allocation5 + $0x2a4] ss:$12 sps:$4 sm:$0xff]  }
  0x68   :  { %1419 = vmatpush1.bf16.msra.mxu0 %v2633_v20  ;;  %2424 = vmatprep.subr.bf16.mxu1 %v2691_v40  ;;  %v2690_v20 = vld [vmem:[#allocation5 + $0x214] ss:$12 sps:$4 sm:$0xff]   ;;  %v2751_v33 = vld [vmem:[#allocation5 + $0x3f8] ss:$12 sps:$4 sm:$0xff]   ;;  %v2757_v40 = vld [vmem:[#allocation5 + $0x350] ss:$12 sps:$4 sm:$0xff]  }
  0x69   :  { %1420 = vmatprep.subr.bf16.mxu0 %v2634_v21  ;;  %v2737_v21 = vld [vmem:[#allocation5 + $0x230] ss:$12 sps:$4 sm:$0xff]   ;;  %v2752_v36 = vld [vmem:[#allocation5 + $0x338] ss:$12 sps:$4 sm:$0xff]   ;;  %v2710_v39 = vld [vmem:[#allocation5 + $0x274] ss:$12 sps:$4 sm:$0xff]  }
  0x6a   :  { %v2767_v51 = vld [vmem:[#allocation5 + $0x380] ss:$12 sps:$4 sm:$0xff]   ;;  %v2743_v12 = vld [vmem:[#allocation5 + $0x318] ss:$12 sps:$4 sm:$0xff]  }
  0x6b   :  { %2425 = vmatpush3.bf16.msra.mxu1 %v2692_v43  ;;  %v2715_v43 = vld [vmem:[#allocation5 + $0x28c] ss:$12 sps:$4 sm:$0xff]   ;;  %v2750_v13 = vld [vmem:[#allocation5 + $0x334] ss:$12 sps:$4 sm:$0xff]  }
  0x6c   :  { %1421 = vmatpush1.bf16.msra.mxu0 %v2636_v24  ;;  %2426 = vmatprep.subr.bf16.mxu1 %v2696_v44  ;;  %v93_v24 = vld [vmem:[#allocation2 + $0x50] sm:$0xff] }
  0x6d   :  { %1422 = vmatprep.subr.bf16.mxu0 %v2637_v25  ;;  %v2688_v25 = vld [vmem:[#allocation5 + $0x210] ss:$12 sps:$4 sm:$0xff]   ;;  %v2762_v44 = vld [vmem:[#allocation5 + $0x368] ss:$12 sps:$4 sm:$0xff]  }
  0x6f   :  { %2427 = vmatpush3.bf16.msra.mxu1 %v2697_v47  ;;  %v96_v47 = vld [vmem:[#allocation2 + $0x68] sm:$0xff] }
  0x70   :  { %1423 = vmatpush1.bf16.msra.mxu0 %v2639_v28  ;;  %2434 = vmatprep.subr.bf16.mxu1 %v2701_v48  ;;  %v3131_v28 = vpack.c.bf16 %v93_v24, %v85_v22  ;;  %v2713_v48 = vld [vmem:[#allocation5 + $0x288] ss:$12 sps:$4 sm:$0xff]   ;;  %v2806_v22 = vld [vmem:[#allocation5 + $0x5c0] ss:$12 sps:$4 sm:$0xff]   ;;  %v2760_v24 = vld [vmem:[#allocation5 + $0x364] ss:$12 sps:$4 sm:$0xff]  }
  0x71   :  { %1424 = vmatprep.subr.bf16.mxu0 %v2640_v31  ;;  %v2700_v31 = vld [vmem:[#allocation5 + $0x244] ss:$12 sps:$4 sm:$0xff]  }
  0x72   :  { %1609 = vmatmul.mubr.bf16.vlgmr.msra.gmra.mrb[0].mxu1 %v99_v54 }
  0x73   :  { %2435 = vmatpush3.bf16.msra.mxu1 %v2702_v53  ;;  %1649 = vmatprep.mubr.bf16.mxu1 %v102_v14  ;;  %v2718_v53 = vld [vmem:[#allocation5 + $0x2a0] ss:$12 sps:$4 sm:$0xff]  }
  0x74   :  { %1425 = vmatpush1.bf16.msra.mxu0 %v2642_v32  ;;  %2436 = vmatprep.subr.bf16.mxu1 %v2706_v55  ;;  %v2747_v32 = vld [vmem:[#allocation5 + $0x320] ss:$12 sps:$4 sm:$0xff]   ;;  %v2772_v55 = vld [vmem:[#allocation5 + $0x398] ss:$12 sps:$4 sm:$0xff]  }
  0x75   :  { %1426 = vmatprep.subr.bf16.mxu0 %v2643_v35  ;;  %v2705_v35 = vld [vmem:[#allocation5 + $0x25c] ss:$12 sps:$4 sm:$0xff]  }
  0x77   :  { %2437 = vmatpush3.bf16.msra.mxu1 %v2707_v57  ;;  %v2723_v57 = vld [vmem:[#allocation5 + $0x2b8] ss:$12 sps:$4 sm:$0xff]  }
  0x78   :  { %1427 = vmatpush1.bf16.msra.mxu0 %v2645_v37  ;;  %2438 = vmatprep.subr.bf16.mxu1 %v2711_v59  ;;  %v2756_v37 = vld [vmem:[#allocation5 + $0x410] ss:$12 sps:$4 sm:$0xff]   ;;  %v87_v59 = vld [vmem:[#allocation2 + $0x20] sm:$0xff] }
  0x79   :  { %1428 = vmatprep.subr.bf16.mxu0 %v2646_v38  ;;  %v2703_v38 = vld [vmem:[#allocation5 + $0x258] ss:$12 sps:$4 sm:$0xff]  }
  0x7b   :  { %2439 = vmatpush3.bf16.msra.mxu1 %v2712_v62  ;;  %v2781_v62 = vld [vmem:[#allocation5 + $0x548] ss:$12 sps:$4 sm:$0xff]  }
  0x7c   :  { %1429 = vmatpush1.bf16.msra.mxu0 %v2648_v41  ;;  %2440 = vmatprep.subr.bf16.mxu1 %v2716_v63  ;;  %v2761_v41 = vld [vmem:[#allocation5 + $0x428] ss:$12 sps:$4 sm:$0xff]   ;;  %v2728_v63 = vld [vmem:[#allocation5 + $0x2d0] ss:$12 sps:$4 sm:$0xff]  }
  0x7d   :  { %1430 = vmatprep.subr.bf16.mxu0 %v2649_v42  ;;  %v2708_v42 = vld [vmem:[#allocation5 + $0x270] ss:$12 sps:$4 sm:$0xff]  }
  0x7f   :  { %2441 = vmatpush3.bf16.msra.mxu1 %v2717_v2  ;;  %v2782_v2 = vld [vmem:[#allocation5 + $0x488] ss:$12 sps:$4 sm:$0xff]  }
  0x80   :  { %1431 = vmatpush1.bf16.msra.mxu0 %v2651_v45  ;;  %2442 = vmatprep.subr.bf16.mxu1 %v2721_v3  ;;  %v2766_v45 = vld [vmem:[#allocation5 + $0x440] ss:$12 sps:$4 sm:$0xff]  }
  0x81   :  { %1432 = vmatprep.subr.bf16.mxu0 %v2652_v46  ;;  %v88_v46 = vld [vmem:[#allocation2 + $0x28] sm:$0xff] }
  0x82   :  { %v2786_v3 = vld [vmem:[#allocation5 + $0x560] ss:$12 sps:$4 sm:$0xff]  }
  0x83   :  { %2443 = vmatpush3.bf16.msra.mxu1 %v2722_v6  ;;  %v2787_v6 = vld [vmem:[#allocation5 + $0x4a0] ss:$12 sps:$4 sm:$0xff]  }
  0x84   :  { %1433 = vmatpush1.bf16.msra.mxu0 %v2654_v49  ;;  %2444 = vmatprep.subr.bf16.mxu1 %v2726_v7  ;;  %v104_v49 = vpack.c.bf16 %v96_v47, %v88_v46  ;;  %v2791_v7 = vld [vmem:[#allocation5 + $0x578] ss:$12 sps:$4 sm:$0xff]   ;;  %v2793_v47 = vld [vmem:[#allocation5 + $0x408] ss:$12 sps:$4 sm:$0xff]  }
  0x85   :  { %1434 = vmatprep.subr.bf16.mxu0 %v2655_v52  ;;  %v2771_v52 = vld [vmem:[#allocation5 + $0x458] ss:$12 sps:$4 sm:$0xff]  }
  0x86   :  { %v2795_v46 = vld [vmem:[#allocation5 + $0x40c] ss:$12 sps:$4 sm:$0xff]  }
  0x87   :  { %2445 = vmatpush3.bf16.msra.mxu1 %v2727_v10  ;;  %v2792_v10 = vld [vmem:[#allocation5 + $0x4b8] ss:$12 sps:$4 sm:$0xff]  }
  0x88   :  { %1435 = vmatpush1.bf16.msra.mxu0 %v2657_v56  ;;  %2446 = vmatprep.subr.bf16.mxu1 %v2731_v11  ;;  %v2776_v56 = vld [vmem:[#allocation5 + $0x470] ss:$12 sps:$4 sm:$0xff]  }
  0x89   :  { %1447 = vmatprep.subr.bf16.mxu0 %v2660_v58  ;;  %v2777_v58 = vld [vmem:[#allocation5 + $0x3b0] ss:$12 sps:$4 sm:$0xff]  }
  0x8a   :  { %v2796_v11 = vld [vmem:[#allocation5 + $0x590] ss:$12 sps:$4 sm:$0xff]  }
  0x8b   :  { %1437 = vmatmul.mubr.bf16.vlgmr.msra.gmra.mrb[0].mxu0 %v99_v54  ;;  %2447 = vmatpush3.bf16.msra.mxu1 %v2732_v17  ;;  %v2725_v54 = vld [vmem:[#allocation5 + $0x2bc] ss:$12 sps:$4 sm:$0xff]  }
  0x8c   :  { %1448 = vmatpush1.bf16.msra.mxu0 %v2658_v60  ;;  %1479 = vmatprep.mubr.bf16.mxu0 %v102_v14  ;;  %v95_v60 = vld [vmem:[#allocation2 + $0x60] sm:$0xff]  ;;  %v2797_v14 = vld [vmem:[#allocation5 + $0x4d0] ss:$12 sps:$4 sm:$0xff]  }
  0x8d   :  { %1449 = vmatprep.subr.bf16.mxu0 %v2665_v61  ;;  %2448 = vmatprep.subr.bf16.mxu1 %v2736_v18  ;;  %v2730_v61 = vld [vmem:[#allocation5 + $0x2d4] ss:$12 sps:$4 sm:$0xff]   ;;  %v98_v17 = vld [vmem:[#allocation2 + $0x78] sm:$0xff] }
  0x8e   :  { %v2748_v18 = vld [vmem:[#allocation5 + $0x330] ss:$12 sps:$4 sm:$0xff]  }
  0x8f   :  { %2449 = vmatpush3.bf16.msra.mxu1 %v2737_v21  ;;  %v2802_v21 = vld [vmem:[#allocation5 + $0x4e8] ss:$12 sps:$4 sm:$0xff]  }
  0x90   :  { %1450 = vmatpush1.bf16.msra.mxu0 %v2663_v0  ;;  %2456 = vmatprep.subr.bf16.mxu1 %v2741_v23  ;;  %v3134_v0 = vpack.c.bf16 %v95_v60, %v87_v59  ;;  %v2753_v23 = vld [vmem:[#allocation5 + $0x348] ss:$12 sps:$4 sm:$0xff]   ;;  %v2821_v59 = vld [vmem:[#allocation5 + $0x498] ss:$12 sps:$4 sm:$0xff]  }
  0x91   :  { %1451 = vmatprep.subr.bf16.mxu0 %v2670_v1  ;;  %v2735_v1 = vld [vmem:[#allocation5 + $0x2ec] ss:$12 sps:$4 sm:$0xff]   ;;  %v2826_v60 = vld [vmem:[#allocation5 + $0x4b4] ss:$12 sps:$4 sm:$0xff]  }
  0x92   :  { %1650 = vmatmul.mubr.bf16.vlgmr.msra.gmra.mrb[4].mxu1 %v3131_v28 }
  0x93   :  { %2457 = vmatpush3.bf16.msra.mxu1 %v2742_v26  ;;  %1690 = vmatprep.mubr.bf16.mxu1 %v104_v49  ;;  %v2811_v26 = vld [vmem:[#allocation5 + $0x5d8] ss:$12 sps:$4 sm:$0xff]  }
  0x94   :  { %1452 = vmatpush1.bf16.msra.mxu0 %v2668_v4  ;;  %2458 = vmatprep.subr.bf16.mxu1 %v2746_v29  ;;  %v2733_v4 = vld [vmem:[#allocation5 + $0x2e8] ss:$12 sps:$4 sm:$0xff]   ;;  %v2812_v29 = vld [vmem:[#allocation5 + $0x518] ss:$12 sps:$4 sm:$0xff]  }
  0x95   :  { %1453 = vmatprep.subr.bf16.mxu0 %v2675_v5  ;;  %v2740_v5 = vld [vmem:[#allocation5 + $0x304] ss:$12 sps:$4 sm:$0xff]  }
  0x97   :  { %2459 = vmatpush3.bf16.msra.mxu1 %v2747_v32  ;;  %v2817_v32 = vld [vmem:[#allocation5 + $0x530] ss:$12 sps:$4 sm:$0xff]  }
  0x98   :  { %1454 = vmatpush1.bf16.msra.mxu0 %v2673_v8  ;;  %2460 = vmatprep.subr.bf16.mxu1 %v2751_v33  ;;  %v2738_v8 = vld [vmem:[#allocation5 + $0x300] ss:$12 sps:$4 sm:$0xff]   ;;  %v89_v33 = vld [vmem:[#allocation2 + $0x30] sm:$0xff] }
  0x99   :  { %1455 = vmatprep.subr.bf16.mxu0 %v2680_v9  ;;  %v2745_v9 = vld [vmem:[#allocation5 + $0x31c] ss:$12 sps:$4 sm:$0xff]  }
  0x9b   :  { %2461 = vmatpush3.bf16.msra.mxu1 %v2752_v36 }
  0x9c   :  { %1456 = vmatpush1.bf16.msra.mxu0 %v2678_v15  ;;  %2462 = vmatprep.subr.bf16.mxu1 %v2756_v37  ;;  %v2801_v15 = vld [vmem:[#allocation5 + $0x5a8] ss:$12 sps:$4 sm:$0xff]   ;;  %v2768_v37 = vld [vmem:[#allocation5 + $0x390] ss:$12 sps:$4 sm:$0xff]  }
  0x9d   :  { %1457 = vmatprep.subr.bf16.mxu0 %v2685_v16  ;;  %v90_v16 = vld [vmem:[#allocation2 + $0x38] sm:$0xff] }
  0x9f   :  { %2463 = vmatpush3.bf16.msra.mxu1 %v2757_v40  ;;  %v2780_v40 = vld [vmem:[#allocation5 + $0x3c4] ss:$12 sps:$4 sm:$0xff]  }
  0xa0   :  { %1458 = vmatpush1.bf16.msra.mxu0 %v2683_v19  ;;  %2464 = vmatprep.subr.bf16.mxu1 %v2761_v41  ;;  %v3138_v19 = vpack.c.bf16 %v98_v17, %v90_v16  ;;  %v2778_v41 = vld [vmem:[#allocation5 + $0x3c0] ss:$12 sps:$4 sm:$0xff]   ;;  %v2856_v16 = vld [vmem:[#allocation5 + $0x5a4] ss:$12 sps:$4 sm:$0xff]  }
  0xa1   :  { %1459 = vmatprep.subr.bf16.mxu0 %v2690_v20  ;;  %v2755_v20 = vld [vmem:[#allocation5 + $0x34c] ss:$12 sps:$4 sm:$0xff]  }
  0xa2   :  { %v2854_v17 = vld [vmem:[#allocation5 + $0x5a0] ss:$12 sps:$4 sm:$0xff]  }
  0xa3   :  { %2465 = vmatpush3.bf16.msra.mxu1 %v2762_v44  ;;  %v2790_v44 = vld [vmem:[#allocation5 + $0x3f4] ss:$12 sps:$4 sm:$0xff]  }
  0xa4   :  { %1460 = vmatpush1.bf16.msra.mxu0 %v2688_v25  ;;  %2466 = vmatprep.subr.bf16.mxu1 %v2766_v45  ;;  %v2807_v25 = vld [vmem:[#allocation5 + $0x500] ss:$12 sps:$4 sm:$0xff]   ;;  %v2788_v45 = vld [vmem:[#allocation5 + $0x3f0] ss:$12 sps:$4 sm:$0xff]  }
  0xa5   :  { %1461 = vmatprep.subr.bf16.mxu0 %v2695_v27  ;;  %v2758_v27 = vld [vmem:[#allocation5 + $0x360] ss:$12 sps:$4 sm:$0xff]  }
  0xa7   :  { %2467 = vmatpush3.bf16.msra.mxu1 %v2767_v51  ;;  %v2803_v51 = vld [vmem:[#allocation5 + $0x438] ss:$12 sps:$4 sm:$0xff]  }
  0xa8   :  { %1462 = vmatpush1.bf16.msra.mxu0 %v2693_v30  ;;  %2468 = vmatprep.subr.bf16.mxu1 %v2771_v52  ;;  %v2816_v30 = vld [vmem:[#allocation5 + $0x5f0] ss:$12 sps:$4 sm:$0xff]   ;;  %v2810_v52 = vld [vmem:[#allocation5 + $0x454] ss:$12 sps:$4 sm:$0xff]  }
  0xa9   :  { %1463 = vmatprep.subr.bf16.mxu0 %v2700_v31  ;;  %v2763_v31 = vld [vmem:[#allocation5 + $0x378] ss:$12 sps:$4 sm:$0xff]  }
  0xab   :  { %2469 = vmatpush3.bf16.msra.mxu1 %v2772_v55  ;;  %v2813_v55 = vld [vmem:[#allocation5 + $0x468] ss:$12 sps:$4 sm:$0xff]  }
  0xac   :  { %1464 = vmatpush1.bf16.msra.mxu0 %v2698_v34  ;;  %2470 = vmatprep.subr.bf16.mxu1 %v2776_v56  ;;  %v97_v34 = vld [vmem:[#allocation2 + $0x70] sm:$0xff] }
  0xad   :  { %1465 = vmatprep.subr.bf16.mxu0 %v2705_v35  ;;  %v2770_v35 = vld [vmem:[#allocation5 + $0x394] ss:$12 sps:$4 sm:$0xff]   ;;  %v3141_v36 = vpack.c.bf16 %v97_v34, %v89_v33  ;;  %v2820_v56 = vld [vmem:[#allocation5 + $0x484] ss:$12 sps:$4 sm:$0xff]   ;;  %v2876_v34 = vld [vmem:[#allocation7 + $0x68] sm:$0xff]  }
  0xae   :  { %v2875_v33 = vld [vmem:[#allocation7 + $0x20] sm:$0xff]  }
  0xaf   :  { %2471 = vmatpush3.bf16.msra.mxu1 %v2777_v58  ;;  %v2823_v58 = vld [vmem:[#allocation5 + $0x49c] ss:$12 sps:$4 sm:$0xff]  }
  0xb0   :  { %1466 = vmatpush1.bf16.msra.mxu0 %v2703_v38  ;;  %2478 = vmatprep.subr.bf16.mxu1 %v2781_v62  ;;  %v2775_v38 = vld [vmem:[#allocation5 + $0x3ac] ss:$12 sps:$4 sm:$0xff]  }
  0xb1   :  { %1467 = vmatprep.subr.bf16.mxu0 %v2710_v39  ;;  %v2773_v39 = vld [vmem:[#allocation5 + $0x3a8] ss:$12 sps:$4 sm:$0xff]   ;;  %v2829_v62 = vld [vmem:[#allocation5 + $0x4cc] ss:$12 sps:$4 sm:$0xff]  }
  0xb2   :  { %1691 = vmatmul.mubr.bf16.vlgmr.msra.gmra.mrb[8].mxu1 %v3134_v0 }
  0xb3   :  { %2479 = vmatpush3.bf16.msra.mxu1 %v2782_v2  ;;  %1731 = vmatprep.mubr.bf16.mxu1 %v3138_v19  ;;  %v2830_v2 = vld [vmem:[#allocation5 + $0x4e0] ss:$12 sps:$4 sm:$0xff]  }
  0xb4   :  { %1468 = vmatpush1.bf16.msra.mxu0 %v2708_v42  ;;  %2480 = vmatprep.subr.bf16.mxu1 %v2786_v3  ;;  %v2785_v42 = vld [vmem:[#allocation5 + $0x3dc] ss:$12 sps:$4 sm:$0xff]  }
  0xb5   :  { %1469 = vmatprep.subr.bf16.mxu0 %v2715_v43  ;;  %v2783_v43 = vld [vmem:[#allocation5 + $0x3d8] ss:$12 sps:$4 sm:$0xff]   ;;  %v2835_v3 = vld [vmem:[#allocation5 + $0x4fc] ss:$12 sps:$4 sm:$0xff]  }
  0xb7   :  { %2481 = vmatpush3.bf16.msra.mxu1 %v2787_v6  ;;  %v2841_v6 = vld [vmem:[#allocation5 + $0x52c] ss:$12 sps:$4 sm:$0xff]  }
  0xb8   :  { %1470 = vmatpush1.bf16.msra.mxu0 %v2713_v48  ;;  %2482 = vmatprep.subr.bf16.mxu1 %v2791_v7  ;;  %v2800_v48 = vld [vmem:[#allocation5 + $0x424] ss:$12 sps:$4 sm:$0xff]   ;;  %v2839_v7 = vld [vmem:[#allocation5 + $0x528] ss:$12 sps:$4 sm:$0xff]  }
  0xb9   :  { %1471 = vmatprep.subr.bf16.mxu0 %v2720_v50  ;;  %v2805_v50 = vld [vmem:[#allocation5 + $0x43c] ss:$12 sps:$4 sm:$0xff]  }
  0xbb   :  { %2483 = vmatpush3.bf16.msra.mxu1 %v2792_v10  ;;  %v2847_v10 = vld [vmem:[#allocation5 + $0x55c] ss:$12 sps:$4 sm:$0xff]  }
  0xbc   :  { %1472 = vmatpush1.bf16.msra.mxu0 %v2718_v53  ;;  %2484 = vmatprep.subr.bf16.mxu1 %v2796_v11  ;;  %v2808_v53 = vld [vmem:[#allocation5 + $0x450] ss:$12 sps:$4 sm:$0xff]   ;;  %v2845_v11 = vld [vmem:[#allocation5 + $0x558] ss:$12 sps:$4 sm:$0xff]  }
  0xbd   :  { %1473 = vmatprep.subr.bf16.mxu0 %v2725_v54  ;;  %v2815_v54 = vld [vmem:[#allocation5 + $0x46c] ss:$12 sps:$4 sm:$0xff]  }
  0xbf   :  { %2485 = vmatpush3.bf16.msra.mxu1 %v2797_v14  ;;  %v2853_v14 = vld [vmem:[#allocation5 + $0x58c] ss:$12 sps:$4 sm:$0xff]  }
  0xc0   :  { %1474 = vmatpush1.bf16.msra.mxu0 %v2723_v57  ;;  %2486 = vmatprep.subr.bf16.mxu1 %v2801_v15  ;;  %v2818_v57 = vld [vmem:[#allocation5 + $0x480] ss:$12 sps:$4 sm:$0xff]   ;;  %v2851_v15 = vld [vmem:[#allocation5 + $0x588] ss:$12 sps:$4 sm:$0xff]  }
  0xc1   :  { %1475 = vmatprep.subr.bf16.mxu0 %v2730_v61  ;;  %v2824_v61 = vld [vmem:[#allocation5 + $0x4b0] ss:$12 sps:$4 sm:$0xff]  }
  0xc3   :  { %2487 = vmatpush3.bf16.msra.mxu1 %v2802_v21  ;;  %v2860_v21 = vld [vmem:[#allocation5 + $0x5d0] ss:$12 sps:$4 sm:$0xff]  }
  0xc4   :  { %1476 = vmatpush1.bf16.msra.mxu0 %v2728_v63  ;;  %2488 = vmatprep.subr.bf16.mxu1 %v2806_v22  ;;  %v2827_v63 = vld [vmem:[#allocation5 + $0x4c8] ss:$12 sps:$4 sm:$0xff]   ;;  %v2866_v22 = vld [vmem:[#allocation7 + $0x40] sm:$0xff]  }
  0xc5   :  { %1477 = vmatprep.subr.bf16.mxu0 %v2735_v1  ;;  %v2832_v1 = vld [vmem:[#allocation5 + $0x4e4] ss:$12 sps:$4 sm:$0xff]  }
  0xc7   :  { %2489 = vmatpush3.bf16.msra.mxu1 %v2807_v25  ;;  %v2865_v25 = vld [vmem:[#allocation5 + $0x5ec] ss:$12 sps:$4 sm:$0xff]  }
  0xc8   :  { %1478 = vmatpush1.bf16.msra.mxu0 %v2733_v4  ;;  %2490 = vmatprep.subr.bf16.mxu1 %v2811_v26  ;;  %v2838_v4 = vld [vmem:[#allocation5 + $0x514] ss:$12 sps:$4 sm:$0xff]   ;;  %v2869_v26 = vld [vmem:[#allocation7 + $0x8] sm:$0xff]  }
  0xc9   :  { %1490 = vmatprep.subr.bf16.mxu0 %v2740_v5  ;;  %v2836_v5 = vld [vmem:[#allocation5 + $0x510] ss:$12 sps:$4 sm:$0xff]  }
  0xcb   :  { %1480 = vmatmul.mubr.bf16.vlgmr.msra.gmra.mrb[0].mxu0 %v3131_v28  ;;  %v2765_v28 = vld [vmem:[#allocation5 + $0x37c] ss:$12 sps:$4 sm:$0xff]   ;;  %2491 = vmatpush3.bf16.msra.mxu1 %v2812_v29  ;;  %v2871_v29 = vld [vmem:[#allocation7 + $0x10] sm:$0xff]  }
  0xcc   :  { %1491 = vmatpush1.bf16.msra.mxu0 %v2738_v8  ;;  %1522 = vmatprep.mubr.bf16.mxu0 %v104_v49  ;;  %v2798_v49 = vld [vmem:[#allocation5 + $0x420] ss:$12 sps:$4 sm:$0xff]   ;;  %v2844_v8 = vld [vmem:[#allocation5 + $0x544] ss:$12 sps:$4 sm:$0xff]  }
  0xcd   :  { %1492 = vmatprep.subr.bf16.mxu0 %v2745_v9  ;;  %2492 = vmatprep.subr.bf16.mxu1 %v2816_v30  ;;  %v2842_v9 = vld [vmem:[#allocation5 + $0x540] ss:$12 sps:$4 sm:$0xff]   ;;  %v2872_v30 = vld [vmem:[#allocation7 + $0x58] sm:$0xff]  }
  0xcf   :  { %2493 = vmatpush3.bf16.msra.mxu1 %v2817_v32  ;;  %v2874_v32 = vld [vmem:[#allocation7 + $0x60] sm:$0xff]  }
  0xd0   :  { %1493 = vmatpush1.bf16.msra.mxu0 %v2743_v12  ;;  %v2850_v12 = vld [vmem:[#allocation5 + $0x574] ss:$12 sps:$4 sm:$0xff]   ;;  %2500 = vmatprep.subr.bf16.mxu1 %v2866_v22 }
  0xd1   :  { %1494 = vmatprep.subr.bf16.mxu0 %v2750_v13  ;;  %v2848_v13 = vld [vmem:[#allocation5 + $0x570] ss:$12 sps:$4 sm:$0xff]  }
  0xd2   :  { %1732 = vmatmul.mubr.bf16.vlgmr.msra.gmra.mrb[12].mxu1 %v3141_v36 }
  0xd4   :  { %1495 = vmatpush1.bf16.msra.mxu0 %v2748_v18  ;;  %v2859_v18 = vld [vmem:[#allocation5 + $0x5bc] ss:$12 sps:$4 sm:$0xff]  }
  0xd5   :  { %1496 = vmatprep.subr.bf16.mxu0 %v2755_v20  ;;  %v2862_v20 = vld [vmem:[#allocation5 + $0x5d4] ss:$12 sps:$4 sm:$0xff]  }
  0xd8   :  { %1497 = vmatpush1.bf16.msra.mxu0 %v2753_v23  ;;  %v2867_v23 = vld [vmem:[#allocation7] sm:$0xff]  }
  0xd9   :  { %1498 = vmatprep.subr.bf16.mxu0 %v2760_v24  ;;  %v2868_v24 = vld [vmem:[#allocation7 + $0x48] sm:$0xff]   ;;  %2501 = vmatpush3.bf16.msra.mxu1 %v2867_v23 }
  0xda   :  { %2502 = vmatprep.subr.bf16.mxu1 %v2868_v24 }
  0xdc   :  { %1499 = vmatpush1.bf16.msra.mxu0 %v2758_v27  ;;  %v2863_v27 = vld [vmem:[#allocation5 + $0x5e8] ss:$12 sps:$4 sm:$0xff]  }
  0xdd   :  { %1500 = vmatprep.subr.bf16.mxu0 %v2765_v28  ;;  %v2870_v28 = vld [vmem:[#allocation7 + $0x50] sm:$0xff]   ;;  %2503 = vmatpush3.bf16.msra.mxu1 %v2869_v26 }
  0xde   :  { %2504 = vmatprep.subr.bf16.mxu1 %v2870_v28 }
  0xe0   :  { %1501 = vmatpush1.bf16.msra.mxu0 %v2763_v31  ;;  %v2873_v31 = vld [vmem:[#allocation7 + $0x18] sm:$0xff]  }
  0xe1   :  { %1502 = vmatprep.subr.bf16.mxu0 %v2770_v35  ;;  %2505 = vmatpush3.bf16.msra.mxu1 %v2871_v29  ;;  %v2877_v35 = vld [vmem:[#allocation7 + $0x28] sm:$0xff]  }
  0xe2   :  { %2506 = vmatprep.subr.bf16.mxu1 %v2872_v30 }
  0xe4   :  { %1503 = vmatpush1.bf16.msra.mxu0 %v2768_v37 }
  0xe5   :  { %1504 = vmatprep.subr.bf16.mxu0 %v2775_v38  ;;  %2507 = vmatpush3.bf16.msra.mxu1 %v2873_v31 }
  0xe6   :  { %2508 = vmatprep.subr.bf16.mxu1 %v2874_v32 }
  0xe8   :  { %1505 = vmatpush1.bf16.msra.mxu0 %v2773_v39 }
  0xe9   :  { %1506 = vmatprep.subr.bf16.mxu0 %v2780_v40  ;;  %2509 = vmatpush3.bf16.msra.mxu1 %v2875_v33 }
  0xea   :  { %2510 = vmatprep.subr.bf16.mxu1 %v2876_v34 }
  0xec   :  { %1507 = vmatpush1.bf16.msra.mxu0 %v2778_v41 }
  0xed   :  { %1508 = vmatprep.subr.bf16.mxu0 %v2785_v42  ;;  %2511 = vmatpush3.bf16.msra.mxu1 %v2877_v35  ;;  %v2882_v35 = vld [vmem:[#allocation7 + $0x80] sm:$0xff]  }
  0xf0   :  { %1509 = vmatpush1.bf16.msra.mxu0 %v2783_v43  ;;  %v365_v43 = vlaneseq }
  0xf1   :  { %1510 = vmatprep.subr.bf16.mxu0 %v2790_v44 }
  0xf4   :  { %1511 = vmatpush1.bf16.msra.mxu0 %v2788_v45  ;;  %v363_v45 = vld [vmem:[%s3190_s2] sm:$0x7] }
  0xf5   :  { %1512 = vmatprep.subr.bf16.mxu0 %v2795_v46 }
  0xf8   :  { %1513 = vmatpush1.bf16.msra.mxu0 %v2793_v47 }
  0xf9   :  { %1514 = vmatprep.subr.bf16.mxu0 %v2800_v48 }
  0xfc   :  { %1515 = vmatpush1.bf16.msra.mxu0 %v2798_v49 }
  0xfd   :  { %1516 = vmatprep.subr.bf16.mxu0 %v2805_v50 }
 0x100   :  { %1517 = vmatpush1.bf16.msra.mxu0 %v2803_v51 }
 0x101   :  { %1518 = vmatprep.subr.bf16.mxu0 %v2810_v52 }
 0x104   :  { %1519 = vmatpush1.bf16.msra.mxu0 %v2808_v53 }
 0x105   :  { %1520 = vmatprep.subr.bf16.mxu0 %v2815_v54 }
 0x108   :  { %1521 = vmatpush1.bf16.msra.mxu0 %v2813_v55 }
 0x109   :  { %1533 = vmatprep.subr.bf16.mxu0 %v2820_v56 }
 0x10b   :  { %1523 = vmatmul.mubr.bf16.vlgmr.msra.gmra.mrb[0].mxu0 %v3134_v0  ;;  %v2833_v0 = vld [vmem:[#allocation5 + $0x4f8] ss:$12 sps:$4 sm:$0xff]  }
 0x10c   :  { %1534 = vmatpush1.bf16.msra.mxu0 %v2818_v57  ;;  %1565 = vmatprep.mubr.bf16.mxu0 %v3138_v19  ;;  %v2857_v19 = vld [vmem:[#allocation5 + $0x5b8] ss:$12 sps:$4 sm:$0xff]  }
 0x10d   :  { %1535 = vmatprep.subr.bf16.mxu0 %v2823_v58 }
 0x110   :  { %1536 = vmatpush1.bf16.msra.mxu0 %v2821_v59 }
 0x111   :  { %1537 = vmatprep.subr.bf16.mxu0 %v2826_v60 }
 0x114   :  { %1538 = vmatpush1.bf16.msra.mxu0 %v2824_v61 }
 0x115   :  { %1539 = vmatprep.subr.bf16.mxu0 %v2829_v62 }
 0x118   :  { %1540 = vmatpush1.bf16.msra.mxu0 %v2827_v63 }
 0x119   :  { %1541 = vmatprep.subr.bf16.mxu0 %v2832_v1 }
 0x11c   :  { %1542 = vmatpush1.bf16.msra.mxu0 %v2830_v2  ;;  %v2878_v2 = vld [vmem:[#allocation7 + $0x70] sm:$0xff]  }
 0x11d   :  { %1543 = vmatprep.subr.bf16.mxu0 %v2835_v3  ;;  %v2879_v3 = vld [vmem:[#allocation7 + $0x30] sm:$0xff]   ;;  %2512 = vmatprep.subr.bf16.mxu1 %v2878_v2 }
 0x11e   :  { %2513 = vmatpush3.bf16.msra.mxu1 %v2879_v3 }
 0x120   :  { %1544 = vmatpush1.bf16.msra.mxu0 %v2833_v0  ;;  %v2880_v0 = vld [vmem:[#allocation7 + $0x78] sm:$0xff]  }
 0x121   :  { %1545 = vmatprep.subr.bf16.mxu0 %v2838_v4  ;;  %v2881_v4 = vld [vmem:[#allocation7 + $0x38] sm:$0xff]   ;;  %2514 = vmatprep.subr.bf16.mxu1 %v2880_v0 }
 0x122   :  { %2515 = vmatpush3.bf16.msra.mxu1 %v2881_v4 }
 0x124   :  { %1546 = vmatpush1.bf16.msra.mxu0 %v2836_v5  ;;  %v3033_v5 = vmov 0.0  }
 0x125   :  { %1547 = vmatprep.subr.bf16.mxu0 %v2841_v6  ;;  %2540 = vmatprep.subr.bf16.mxu1 %v3033_v5 }
 0x128   :  { %1548 = vmatpush1.bf16.msra.mxu0 %v2839_v7 }
 0x129   :  { %1549 = vmatprep.subr.bf16.mxu0 %v2844_v8 }
 0x12c   :  { %1550 = vmatpush1.bf16.msra.mxu0 %v2842_v9 }
 0x12d   :  { %1551 = vmatprep.subr.bf16.mxu0 %v2847_v10 }
 0x130   :  { %1552 = vmatpush1.bf16.msra.mxu0 %v2845_v11 }
 0x131   :  { %1553 = vmatprep.subr.bf16.mxu0 %v2850_v12 }
 0x134   :  { %1554 = vmatpush1.bf16.msra.mxu0 %v2848_v13 }
 0x135   :  { %1555 = vmatprep.subr.bf16.mxu0 %v2853_v14 }
 0x138   :  { %1556 = vmatpush1.bf16.msra.mxu0 %v2851_v15 }
 0x139   :  { %1557 = vmatprep.subr.bf16.mxu0 %v2856_v16 }
 0x13c   :  { %1558 = vmatpush1.bf16.msra.mxu0 %v2854_v17 }
 0x13d   :  { %1559 = vmatprep.subr.bf16.mxu0 %v2859_v18 }
 0x140   :  { %1560 = vmatpush1.bf16.msra.mxu0 %v2857_v19 }
 0x141   :  { %1561 = vmatprep.subr.bf16.mxu0 %v2862_v20 }
 0x144   :  { %1562 = vmatpush1.bf16.msra.mxu0 %v2860_v21 }
 0x145   :  { %1563 = vmatprep.subr.bf16.mxu0 %v2865_v25  ;;  %v2428_v37 = vpop.f32.mrb[0].mxu1 }
 0x146   :  { %v2429_v38 = vpop.f32.mrb[1].mxu1 }
 0x147   :  { %v2430_v39 = vadd.f32 %v2429_v38, %v2428_v37  ;;  %v2431_v40 = vpop.f32.mrb[2].mxu1  ;;  %v2883_v37 = vld [vmem:[#allocation7 + $0x88] sm:$0xff]   ;;  %v2884_v38 = vld [vmem:[#allocation7 + $0x90] sm:$0xff]  }
 0x148   :  { %1564 = vmatpush1.bf16.msra.mxu0 %v2863_v27  ;;  %v2432_v41 = vpop.f32.mrb[3].mxu1 }
 0x149   :  { %v2433_v42 = vadd.f32 %v2432_v41, %v2431_v40  ;;  %v2886_v40 = vld [vmem:[#allocation7 + $0xa0] sm:$0xff]   ;;  %v2887_v41 = vld [vmem:[#allocation7 + $0xa8] sm:$0xff]  }
 0x14b   :  { %1566 = vmatmul.mubr.bf16.vlgmr.msra.gmra.mrb[0].mxu0 %v3141_v36  ;;  %v366_v36 = vshrl.u32 %v365_v43, 7  ;;  %v2889_v43 = vld [vmem:[#allocation7 + $0xb8] sm:$0xff]  }
 0x14d   :  { %v375_v44 = vsub.s32 2, %v366_v36  ;;  %v367_v17 = vsub.s32 0, %v366_v36  ;;  %v371_v18 = vsub.s32 1, %v366_v36  ;;  %v2890_v36 = vld [vmem:[#allocation8] sm:$0xff]  }
 0x14f   :  { %v376_v46 = vrot.slane %v363_v45, %v375_v44  ;;  %v368_v19 = vrot.slane %v363_v45, %v367_v17  ;;  %v372_v20 = vrot.slane %v363_v45, %v371_v18  ;;  %v2891_v44 = vld [vmem:[#allocation8 + $0x8] sm:$0xff]   ;;  %v2892_v45 = vld [vmem:[#allocation8 + $0x10] sm:$0xff]  }
 0x151   :  { %v1611_v47 = vadd.f32 %v2430_v39, %v376_v46  ;;  %v1614_v50 = vadd.f32 %v2433_v42, %v376_v46  ;;  %v2885_v39 = vld [vmem:[#allocation7 + $0x98] sm:$0xff]   ;;  %v2888_v42 = vld [vmem:[#allocation7 + $0xb0] sm:$0xff]  }
 0x152   :  { %v2893_v46 = vld [vmem:[#allocation8 + $0x18] sm:$0xff]  }
 0x165   :  { %v2450_v48 = vpop.f32.mrb[4].mxu1 }
 0x166   :  { %v2451_v49 = vpop.f32.mrb[5].mxu1 }
 0x167   :  { %v2452_v51 = vadd.f32 %v2451_v49, %v2450_v48  ;;  %v2453_v52 = vpop.f32.mrb[6].mxu1  ;;  %v2895_v48 = vld [vmem:[#allocation8 + $0x28] sm:$0xff]   ;;  %v2896_v49 = vld [vmem:[#allocation8 + $0x30] sm:$0xff]  }
 0x168   :  { %v2454_v53 = vpop.f32.mrb[7].mxu1 }
 0x169   :  { %v1652_v54 = vadd.f32 %v2452_v51, %v1611_v47  ;;  %v2455_v55 = vadd.f32 %v2454_v53, %v2453_v52  ;;  %v2894_v47 = vld [vmem:[#allocation8 + $0x20] sm:$0xff]  }
 0x16b   :  { %v1655_v56 = vadd.f32 %v2455_v55, %v1614_v50  ;;  %v2897_v50 = vld [vmem:[#allocation8 + $0x38] sm:$0xff]  }
 0x185   :  { %v2472_v57 = vpop.f32.mrb[8].mxu1 }
 0x186   :  { %v2473_v58 = vpop.f32.mrb[9].mxu1 }
 0x187   :  { %v2474_v59 = vadd.f32 %v2473_v58, %v2472_v57  ;;  %v2475_v60 = vpop.f32.mrb[10].mxu1  ;;  %v2378_v57 = vld [vmem:[%s3192_s4] ss:$0 sm:$0xff]  ;;  %s3035_s4 = smov [#allocation10]  }
 0x188   :  { %v2476_v61 = vpop.f32.mrb[11].mxu1 }
 0x189   :  { %v1693_v62 = vadd.f32 %v2474_v59, %v1652_v54  ;;  %v2477_v63 = vadd.f32 %v2476_v61, %v2475_v60 }
 0x18b   :  { %v1696_v1 = vadd.f32 %v2477_v63, %v1655_v56 }
 0x1a5   :  { %v2494_v6 = vpop.f32.mrb[12].mxu1 }
 0x1a6   :  { %v2495_v7 = vpop.f32.mrb[13].mxu1 }
 0x1a7   :  { %v2496_v8 = vadd.f32 %v2495_v7, %v2494_v6  ;;  %v2497_v9 = vpop.f32.mrb[14].mxu1 }
 0x1a8   :  { %v2498_v10 = vpop.f32.mrb[15].mxu1 }
 0x1a9   :  { %v1734_v11 = vadd.f32 %v2496_v8, %v1693_v62  ;;  %v2499_v12 = vadd.f32 %v2498_v10, %v2497_v9 }
 0x1ab   :  { %v1742_v13 = vmax.f32 %v1734_v11, 0.0  ;;  %v1737_v14 = vadd.f32 %v2499_v12, %v1696_v1 }
 0x1ad   :  { %v1745_v15 = vmax.f32 %v1737_v14, 0.0 }
 0x1af   :  { %v1748_v16 = vpack.c.bf16 %v1745_v15, %v1742_v13 }
 0x21e   :  { %v1567_v21 = vpop.f32.mrb[0].mxu0 }
 0x21f   :  { %v2580_v22 = vadd.f32 %v1567_v21, %v368_v19  ;;  %v1569_v23 = vpop.f32.mrb[1].mxu0 }
 0x220   :  { %v2581_v24 = vadd.f32 %v1569_v23, %v372_v20  ;;  %v1571_v25 = vpop.f32.mrb[2].mxu0 }
 0x221   :  { %v2582_v26 = vadd.f32 %v1571_v25, %v368_v19  ;;  %v1573_v27 = vpop.f32.mrb[3].mxu0  ;;  %v1740_v29 = vmax.f32 %v2580_v22, 0.0 }
 0x222   :  { %v2583_v28 = vadd.f32 %v1573_v27, %v372_v20  ;;  %v1741_v31 = vmax.f32 %v2581_v24, 0.0 }
 0x223   :  { %v1743_v30 = vmax.f32 %v2582_v26, 0.0 }
 0x224   :  { %v1744_v32 = vmax.f32 %v2583_v28, 0.0 }
 0x225   :  { %v1746_v33 = vpack.c.bf16 %v1743_v30, %v1740_v29 }
 0x226   :  { %v1747_v34 = vpack.c.bf16 %v1744_v32, %v1741_v31 }
 0x228   :  { %1980 = vmatprep.mubr.bf16.mxu1 %v1747_v34 }
 0x229   :  { %1981 = vmatmul.mubr.bf16.vlgmr.msra.gmra.mrb[16].mxu1 %v1746_v33 }
 0x22a   :  { %2541 = vmatpush3.bf16.msra.mxu1 %v2882_v35  ;;  %2556 = vmatprep.mubr.msk.bf16.mxu1 %vm3034_vm0, %v3033_v5 }
 0x22b   :  { %2542 = vmatprep.subr.bf16.mxu1 %v3033_v5 }
 0x22e   :  { %2543 = vmatpush3.bf16.msra.mxu1 %v2883_v37 }
 0x22f   :  { %2544 = vmatprep.subr.bf16.mxu1 %v3033_v5 }
 0x232   :  { %2545 = vmatpush3.bf16.msra.mxu1 %v2884_v38 }
 0x233   :  { %2546 = vmatprep.subr.bf16.mxu1 %v3033_v5 }
 0x236   :  { %2547 = vmatpush3.bf16.msra.mxu1 %v2885_v39 }
 0x237   :  { %2548 = vmatprep.subr.bf16.mxu1 %v3033_v5 }
 0x23a   :  { %2549 = vmatpush3.bf16.msra.mxu1 %v2886_v40 }
 0x23b   :  { %2550 = vmatprep.subr.bf16.mxu1 %v3033_v5 }
 0x23e   :  { %2551 = vmatpush3.bf16.msra.mxu1 %v2887_v41 }
 0x23f   :  { %2552 = vmatprep.subr.bf16.mxu1 %v3033_v5 }
 0x242   :  { %2553 = vmatpush3.bf16.msra.mxu1 %v2888_v42 }
 0x243   :  { %2554 = vmatprep.subr.bf16.mxu1 %v3033_v5 }
 0x246   :  { %2555 = vmatpush3.bf16.msra.mxu1 %v2889_v43 }
 0x247   :  { %2560 = vmatprep.subr.bf16.mxu1 %v3033_v5 }
 0x249   :  { %2557 = vmatmul.mubr.bf16.vlgmr.msra.gmra.mrb[20].mxu1 %v1748_v16 }
 0x24a   :  { %2576 = vmatprep.mubr.msk.bf16.mxu1 %vm3034_vm0, %v3033_v5  ;;  %2561 = vmatpush3.bf16.msra.mxu1 %v2890_v36 }
 0x24b   :  { %2562 = vmatprep.subr.bf16.mxu1 %v3033_v5 }
 0x24e   :  { %2563 = vmatpush3.bf16.msra.mxu1 %v2891_v44 }
 0x24f   :  { %2564 = vmatprep.subr.bf16.mxu1 %v3033_v5 }
 0x252   :  { %2565 = vmatpush3.bf16.msra.mxu1 %v2892_v45 }
 0x253   :  { %2566 = vmatprep.subr.bf16.mxu1 %v3033_v5 }
 0x256   :  { %2567 = vmatpush3.bf16.msra.mxu1 %v2893_v46 }
 0x257   :  { %2568 = vmatprep.subr.bf16.mxu1 %v3033_v5 }
 0x25a   :  { %2569 = vmatpush3.bf16.msra.mxu1 %v2894_v47 }
 0x25b   :  { %2570 = vmatprep.subr.bf16.mxu1 %v3033_v5 }
 0x25e   :  { %2571 = vmatpush3.bf16.msra.mxu1 %v2895_v48 }
 0x25f   :  { %2572 = vmatprep.subr.bf16.mxu1 %v3033_v5 }
 0x262   :  { %2573 = vmatpush3.bf16.msra.mxu1 %v2896_v49 }
 0x263   :  { %2574 = vmatprep.subr.bf16.mxu1 %v3033_v5  ;;  %v2403_v5 = vld [vmem:[%s3194_s6] ss:$0 sm:$0xff]  ;;  %s2172_s6 = sshll.u32 %s3035_s4, 4  ;;  %s2173_s6 = int_to_ptr.vmem [resolvable:$true] %s2172_s6 }
 0x264   :  { %s2994_s8 = scalar_lea.vmem %s2173_s6, 256  ;;  %p2999_p5 = scmp.lt.s32.totalorder %s2173_s6, %s2173_s6 }
 0x265   :  { %p2995_p4 = scmp.ne.s32.totalorder %s2173_s6, %s2994_s8  ;;  %p3000_p6 = scmp.lt.s32.totalorder %s2994_s8, %s2994_s8 }
 0x266   :  { %2575 = vmatpush3.bf16.msra.mxu1 %v2897_v50 }
 0x267   :  { %p3001_p7 = por %p3000_p6, %p2999_p5 }
 0x269   :  { %p3002_p8 = pnand %p3001_p7, %p2995_p4 }
 0x2fc   :  { %v2516_v51 = vpop.f32.mrb[16].mxu1 }
 0x2fd   :  { %v2517_v52 = vpop.f32.mrb[17].mxu1 }
 0x2fe   :  { %v2518_v53 = vadd.f32 %v2517_v52, %v2516_v51  ;;  %v2519_v54 = vpop.f32.mrb[18].mxu1 }
 0x2ff   :  { %v2520_v55 = vpop.f32.mrb[19].mxu1 }
 0x300   :  { %v2521_v56 = vadd.f32 %v2520_v55, %v2519_v54  ;;  %v1983_v58 = vadd.f32 %v2518_v53, %v2378_v57 }
 0x302   :  { %v1986_v62 = vadd.f32 %v2521_v56, %v2378_v57 }
 0x31c   :  { %v2023_v59 = vpop.f32.mrb[20].mxu1 }
 0x31d   :  { %v2024_v60 = vadd.f32 %v2023_v59, %v1983_v58  ;;  %v2558_v61 = vpop.f32.mrb[21].mxu1 }
 0x31e   :  { %v2026_v63 = vpop.f32.mrb[22].mxu1 }
 0x31f   :  { %v2027_v1 = vadd.f32 %v2026_v63, %v1986_v62  ;;  %v2559_v2 = vpop.f32.mrb[23].mxu1  ;;  %v2030_v3 = vmax.f32 %v2024_v60, 0.0 }
 0x321   :  { %v2031_v0 = vmax.f32 %v2027_v1, 0.0 }
 0x323   :  { %v2032_v4 = vpack.c.bf16 %v2031_v0, %v2030_v3 }
 0x325   :  { %2577 = vmatmul.mubr.bf16.vlgmr.msra.gmra.mrb[24].mxu1 %v2032_v4 }
 0x3f8   :  { %v2138_v6 = vpop.f32.mrb[24].mxu1 }
 0x3f9   :  { %v2139_v7 = vadd.f32 %v2403_v5, %v2138_v6  ;;  %v2578_v8 = vpop.f32.mrb[25].mxu1 }
 0x3fa   :  { %v2141_v9 = vpop.f32.mrb[26].mxu1 }
 0x3fb   :  { %2145 = vmax.xlane.f32.xlu0 %v2139_v7  ;;  %v2579_v10 = vpop.f32.mrb[27].mxu1  ;;  %v2142_v11 = vadd.f32 %v2403_v5, %v2141_v9 }
 0x3ff   :  { %2147 = vmax.xlane.f32.xlu0 %v2142_v11 }
 0x488   :  { %v2146_v12 = vpop.xlane.xlu0 %2145 }
 0x489   :  { %v2149_v13 = vsub.f32 %v2139_v7, %v2146_v12 }
 0x48b   :  { %v2151_v14 = vmul.f32 1.442695, %v2149_v13 }
 0x48c   :  { %v2148_v15 = vpop.xlane.xlu0 %2147 }
 0x48d   :  { %v2150_v16 = vsub.f32 %v2142_v11, %v2148_v15  ;;  %2898 = vpow2.f32 %v2151_v14 }
 0x48f   :  { %v2153_v17 = vmul.f32 1.442695, %v2150_v16 }
 0x491   :  { %2900 = vpow2.f32 %v2153_v17 }
 0x497   :  { %v2899_v18 = vpop.eup %2898 }
 0x498   :  { %2155 = vadd.xlane.f32.xlu1 %v2899_v18 }
 0x49b   :  { %v2901_v19 = vpop.eup %2900 }
 0x49c   :  { %2157 = vadd.xlane.f32.xlu1 %v2901_v19 }
 0x525   :  { %v2156_v20 = vpop.xlane.xlu1 %2155 }
 0x526   :  { %2902 = vlog2.f32 %v2156_v20 }
 0x529   :  { %v2158_v21 = vpop.xlane.xlu1 %2157 }
 0x52a   :  { %2904 = vlog2.f32 %v2158_v21 }
 0x530   :  { %v2903_v22 = vpop.eup %2902 }
 0x531   :  { %v2160_v23 = vmul.f32 0.6931472, %v2903_v22 }
 0x533   :  { %v2163_v24 = vsub.f32 %v2149_v13, %v2160_v23 }
 0x534   :  { %v2905_v25 = vpop.eup %2904 }
 0x535   :  { %2165 = vst [vmem:[#allocation10] sm:$0xff] %v2163_v24  ;;  %v2162_v26 = vmul.f32 0.6931472, %v2905_v25 }
 0x537   :  { %v2164_v27 = vsub.f32 %v2150_v16, %v2162_v26 }
 0x539   :  { %2166 = vst [vmem:[#allocation10 + $0x8] sm:$0xff] %v2164_v27 }
 0x53a   :  { %3005 = shalt.err (!%p3002_p8)
}
 0x53b   :  { %s3006_s11 = scalar_lea.hbm %s3195_s7, 256 }
 0x53c   :  { %p3007_p9 = scmp.ne.s32.totalorder %s3195_s7, %s3006_s11  ;;  %p3010_p10 = scmp.lt.u32.totalorder %s3006_s11, %s3195_s7 }
 0x53e   :  { %p3012_p11 = pnand %p3010_p10, %p3007_p9 }
 0x540   :  { %3015 = shalt.err (!%p3012_p11)
}
 0x541   :  { %s3036_s0 = smov 128   ;;  %s3037_s16 = smov 8  }
 0x542   :  { %2178 = dma.vmem_to_hbm [thread:$0]  %s2173_s6, 256, %s3195_s7, [#allocation4], %s3036_s0, %s3036_s0, %s3037_s16  }
 0x543   :  { %3022 = dma.done.wait [#allocation4], 256  }
 0x544   :  { %3023 = vsyncadd [#allocation4], 4294967040 }
 0x545   :  { %2182 = vsyncpa [#allocation3], 1 }
 0x546   :  { %2183 = vsyncpa [#allocation6], 1 }
 0x547   :  { %2184 = vsyncpa [#allocation9], 1 }
 0x548   :  { %2185 = vsyncpa [#allocation4], 1 }

</bundles_post_ra>
